<compile_context>
chip_gen: v7x
topology: tpu7x:2x2x1
jax: 0.10.0
libtpu: 0.0.40
codegen_flags: <defaults>
</compile_context>

<pallas_src>
import math

import jax
import jax.numpy as jnp
from jax.experimental import pallas as pl
from jax.experimental.pallas import tpu as pltpu


# ---------------------------------------------------------------------------
# Kernels
# ---------------------------------------------------------------------------
def _alias_identity_kernel(x_hbm_ref, o_hbm_ref):
    # Output 0 aliases input 0 (input_output_aliases={0: 0}); the output HBM
    # buffer already holds x, so the identity needs no data movement at all.
    del x_hbm_ref, o_hbm_ref


def _copy_kernel(x_ref, o_ref):
    # Whole-tile VMEM copy (only used on the materializing path).
    o_ref[...] = x_ref[...]


# ---------------------------------------------------------------------------
# Wrappers
# ---------------------------------------------------------------------------
def _identity_aliased(x):
    """Zero-traffic identity: output aliases input, kernel is a no-op."""
    return pl.pallas_call(
        _alias_identity_kernel,
        out_shape=jax.ShapeDtypeStruct(x.shape, x.dtype),
        in_specs=[pl.BlockSpec(memory_space=pl.ANY)],
        out_specs=pl.BlockSpec(memory_space=pl.ANY),
        input_output_aliases={0: 0},
    )(x)


_LANE = 128
_MAX_COLS = 2048            # lane width of the 2D slab (multiple of 128)
_SUBLANE_MULT = 32          # covers f32(8) / bf16(16) / int8,fp8(32) packing
_TARGET_TILE_BYTES = 2 * 1024 * 1024


def _round_up(a, b):
    return (a + b - 1) // b * b


def _identity_materialized(x):
    """Identity that materializes a fresh buffer via a big-tile pipelined copy."""
    orig_shape = x.shape
    dtype = x.dtype
    numel = math.prod(orig_shape)
    itemsize = jnp.dtype(dtype).itemsize

    # Lane-dense 2D view with a wide last dim (multiple of 128).
    cols = _MAX_COLS if numel >= _MAX_COLS else _round_up(numel, _LANE)
    rows = _round_up(numel, cols) // cols

    # Tile rows so each block is ~2 MiB (never more than the whole slab).
    row_bytes = cols * itemsize
    tile_rows = min(rows, max(1, _TARGET_TILE_BYTES // row_bytes))
    if tile_rows < rows:
        tile_rows = max(_SUBLANE_MULT, (tile_rows // _SUBLANE_MULT) * _SUBLANE_MULT)
        tile_rows = min(tile_rows, rows)
    # else: full row extent, always a legal block dim.

    rows_padded = _round_up(rows, tile_rows)
    padded_numel = rows_padded * cols

    flat = x.reshape(numel)
    if padded_numel != numel:
        flat = jnp.pad(flat, (0, padded_numel - numel))
    x2d = flat.reshape(rows_padded, cols)

    grid = (rows_padded // tile_rows,)

    out2d = pl.pallas_call(
        _copy_kernel,
        out_shape=jax.ShapeDtypeStruct((rows_padded, cols), dtype),
        grid_spec=pltpu.PrefetchScalarGridSpec(
            num_scalar_prefetch=0,
            grid=grid,
            in_specs=[pl.BlockSpec((tile_rows, cols), lambda i: (i, 0))],
            out_specs=pl.BlockSpec((tile_rows, cols), lambda i: (i, 0)),
        ),
        compiler_params=pltpu.CompilerParams(
            dimension_semantics=("parallel",),  # splits grid across v7x's 2 TCs
        ),
    )(x2d)

    out_flat = out2d.reshape(padded_numel)
    if padded_numel != numel:
        out_flat = out_flat[:numel]
    return out_flat.reshape(orig_shape)


def resnet5ann_forward(x, materialize: bool = False):
    """Pallas implementation of ResNet5ANN.forward (identity).

    materialize=False (default): aliased no-op kernel, ~0 HBM traffic.
    materialize=True: independent output buffer via a lane-dense big-tile copy.
    """
    if materialize:
        return _identity_materialized(x)
    return _identity_aliased(x)


if __name__ == "__main__":
    # NOTE: ResNet5ANN.__init__ declares no real parameters (`self.conv1 = nn`
    # is just the torch.nn module object), so there are no weights to build.
    key = jax.random.PRNGKey(0)
    x = jax.random.normal(key, (2, 4, 16, 16), dtype=jnp.float32)  # NCHW

    # Fast (default) path: aliased no-op kernel.
    y = resnet5ann_forward(x)
    y = jax.block_until_ready(y)
    assert y.shape == x.shape and y.dtype == x.dtype
    assert bool(jnp.all(y == x))

    # Materializing path: large lane-dense tiled copy.
    y2 = resnet5ann_forward(x, materialize=True)
    y2 = jax.block_until_ready(y2)
    assert y2.shape == x.shape and y2.dtype == x.dtype
    assert bool(jnp.all(y2 == x))

    print("KERNEL_OK")
</pallas_src>

<mosaic_0001>
module attributes {stable_mosaic.version = 11 : i64} {
  func.func @_alias_identity_kernel(%arg0: memref<2x4x16x16xf32, #tpu.memory_space<any>>, %arg1: memref<2x4x16x16xf32, #tpu.memory_space<any>>) attributes {dimension_semantics = [], scalar_prefetch = 0 : i64, scratch_operands = 0 : i64, tpu.core_type = #tpu.core_type<tc>} {
    return
  }
}

</mosaic_0001>

<bundles_post_ra>
// kernel: tpu_custom_call.1
= control target key start
LH: loop header
LB: loop body
LE: loop exit
PB: predicated region body
PF: predicated region fallthrough
CT: control target
= control target key end

     0   :  { %s16_s0 = inlined_call_operand.hbm [shape: f32[2,4,16,16], index: 0, kind: input, shape index: {}, may-alias: {0,1}]   ;;  %s17_s1 = inlined_call_operand.hbm [shape: f32[2,4,16,16], index: 1, kind: output, shape index: {}, may-alias: {0,1}]  }

</bundles_post_ra>
